<compile_context>
chip_gen: v6e
topology: v6e:2x2x1
jax: 0.10.0
libtpu: 0.0.40
codegen_flags: <defaults>
</compile_context>

<pallas_src>
import jax
import jax.numpy as jnp
from jax.experimental import pallas as pl
from jax.experimental.pallas import tpu as pltpu

EMBED_DIM = 300      # embed_dim in the module
FILTER_NUM = 128     # filter_num
KERNEL_SIZE = 3      # filters = [3]
NUM_CLASSES = 4      # labels_num


def cnn_kernel(keys_ref, fused_ref, cb_ref, fw_ref, fb_ref, out_ref):
    # keys_ref : (TB*L, K) int32  per-tap gather keys (token id + k*V, time clamped)
    # fused_ref: (K*V, F)  bf16   embedding table folded into conv weights
    # cb_ref   : (1, F)    f32    conv bias
    # fw_ref   : (F, Cp)   bf16   fc weight (classes zero-padded to Cp lanes)
    # fb_ref   : (1, Cp)   f32    fc bias
    # out_ref  : (TB, Cp)  f32    logits block for this batch tile
    TBL, K = keys_ref.shape
    KV, F = fused_ref.shape
    TB = out_ref.shape[0]
    L = TBL // TB

    # ---- one-hot over the folded (K*V) contraction axis ------------------------------
    # Row (b, t) has a 1 in column k*V + ids[b, t+k] for each tap k; the +k*V offsets
    # keep the K column groups disjoint, so a logical OR of the K compares is exact.
    cols = jax.lax.broadcasted_iota(jnp.int32, (TBL, KV), 1)
    hit = cols == keys_ref[:, 0:1]
    for k in range(1, K):
        hit = jnp.logical_or(hit, cols == keys_ref[:, k:k + 1])
    onehot = jnp.where(hit, 1.0, 0.0).astype(jnp.bfloat16)          # (TBL, KV)

    # ---- embedding + Conv1d(k=3) in one tiny-contraction MXU matmul -------------------
    conv = jnp.dot(onehot, fused_ref[...],
                   preferred_element_type=jnp.float32)               # (TBL, F) f32
    conv = jnp.maximum(conv + cb_ref[...], 0.0)                      # bias + ReLU

    # Rows t >= Lout duplicate row Lout-1 (keys were time-clamped in the wrapper),
    # so max over all L positions equals max over the valid conv outputs.
    pooled = jnp.max(conv.reshape(TB, L, F), axis=1)                 # (TB, F)

    # ---- final FC, lane-dense store ---------------------------------------------------
    logits = jnp.dot(pooled.astype(jnp.bfloat16), fw_ref[...],
                     preferred_element_type=jnp.float32) + fb_ref[...]
    out_ref[...] = logits


def cnn_forward(x_ids, params, *, batch_tile=None):
    """x_ids: (sentence_length, batch) int token ids — same signature as torch forward."""
    emb_table, conv_w, conv_b, fc_w, fc_b = params
    L, B = x_ids.shape
    V, D = emb_table.shape
    K, _, F = conv_w.shape
    C = fc_w.shape[1]
    Lout = L - K + 1
    assert Lout >= 1, "sentence_length must be >= kernel_size"
    Cp = 128                                   # lane-dense logits; sliced back to C below

    if batch_tile is None:
        # ~0.35 us per grid step -> use large tiles.  Cap at 128 (TB*L = 2048 MXU rows,
        # ~4 MiB per-tile VMEM incl. double buffering) and aim for >= 2 grid steps so the
        # "parallel" batch axis can shard across both TensorCores on v7x.
        half = max(1, (B + 1) // 2)
        batch_tile = min(128, max(8, ((half + 7) // 8) * 8))
    TB = batch_tile
    assert TB % 8 == 0, "batch_tile must be a multiple of 8"
    B_pad = pl.cdiv(B, TB) * TB

    # ---- wrapper-side param prep: fold the frozen embedding into the conv weights ----
    fused = jnp.einsum('vd,kdf->kvf', emb_table.astype(jnp.float32),
                       conv_w.astype(jnp.float32),
                       precision=jax.lax.Precision.HIGHEST)          # (K, V, F) f32
    fused = fused.reshape(K * V, F).astype(jnp.bfloat16)             # (K*V, F) bf16
    cb = conv_b.reshape(1, F).astype(jnp.float32)
    fw = jnp.pad(fc_w.astype(jnp.bfloat16), ((0, 0), (0, Cp - C)))
    fb = jnp.pad(fc_b.reshape(1, C).astype(jnp.float32), ((0, 0), (0, Cp - C)))

    # ---- wrapper-side input prep: per-tap gather keys with clamped time --------------
    ids = x_ids.T.astype(jnp.int32)                                  # permute(1,0) -> (B, L)
    ids = jnp.pad(ids, ((0, B_pad - B), (0, 0)))                     # pad batch with token 0
    t_src = jnp.minimum(jnp.arange(L), Lout - 1)                     # clamp t >= Lout
    keys = jnp.stack([ids[:, t_src + k] + k * V for k in range(K)], axis=-1)  # (B_pad, L, K)
    keys = keys.reshape(B_pad * L, K).astype(jnp.int32)

    out = pl.pallas_call(
        cnn_kernel,
        out_shape=jax.ShapeDtypeStruct((B_pad, Cp), jnp.float32),
        grid_spec=pltpu.PrefetchScalarGridSpec(
            num_scalar_prefetch=0,
            grid=(B_pad // TB,),
            in_specs=[
                pl.BlockSpec((TB * L, K), lambda b: (b, 0)),         # gather keys (per tile)
                pl.BlockSpec((K * V, F), lambda b: (0, 0)),          # folded emb+conv weight
                pl.BlockSpec((1, F), lambda b: (0, 0)),              # conv bias
                pl.BlockSpec((F, Cp), lambda b: (0, 0)),             # fc weight
                pl.BlockSpec((1, Cp), lambda b: (0, 0)),             # fc bias
            ],
            out_specs=pl.BlockSpec((TB, Cp), lambda b: (b, 0)),      # per-tile, lane-dense
        ),
        compiler_params=pltpu.CompilerParams(
            dimension_semantics=("parallel",)),                      # batch axis -> megacore
    )(keys, fused, cb, fw, fb)

    return out[:B, :C]


def init_params(key, vocab_size):
    """Deterministic synthetic parameters matching the module's shapes."""
    k1, k2, k3, k4, k5 = jax.random.split(key, 5)
    emb_table = jax.random.normal(k1, (vocab_size, EMBED_DIM), jnp.float32)          # nn.Embedding
    conv_w = 0.05 * jax.random.normal(k2, (KERNEL_SIZE, EMBED_DIM, FILTER_NUM),
                                      jnp.float32)                                   # Conv1d weight (K, Cin, Cout)
    conv_b = 0.05 * jax.random.normal(k3, (FILTER_NUM,), jnp.float32)                # Conv1d bias
    fc_w = 0.05 * jax.random.normal(k4, (FILTER_NUM, NUM_CLASSES), jnp.float32)      # Linear weight (in, out)
    fc_b = 0.05 * jax.random.normal(k5, (NUM_CLASSES,), jnp.float32)                 # Linear bias
    return emb_table, conv_w, conv_b, fc_w, fc_b


def reference_forward(x_ids, params):
    """Pure-JAX reference of the torch forward, mirroring the kernel's folded bf16
    weights (fused = table @ conv_w rounded to bf16, fc weight bf16)."""
    emb_table, conv_w, conv_b, fc_w, fc_b = params
    V = emb_table.shape[0]
    K, _, F = conv_w.shape

    fused = jnp.einsum('vd,kdf->kvf', emb_table, conv_w,
                       precision=jax.lax.Precision.HIGHEST)
    fused = fused.astype(jnp.bfloat16).astype(jnp.float32)           # (K, V, F)
    fw = fc_w.astype(jnp.bfloat16).astype(jnp.float32)

    ids = x_ids.T                                                    # (B, L)
    Bn, L = ids.shape
    Lout = L - K + 1
    conv = jnp.zeros((Bn, Lout, F), jnp.float32)
    for k in range(K):                                               # conv = sum_k fused[k][ids shifted]
        conv = conv + fused[k][ids[:, k:k + Lout]]
    conv = jnp.maximum(conv + conv_b, 0.0)
    pooled = jnp.max(conv, axis=1)                                   # (B, F)
    pooled = pooled.astype(jnp.bfloat16).astype(jnp.float32)         # mirror kernel FC input cast
    return jnp.dot(pooled, fw, precision=jax.lax.Precision.HIGHEST) + fc_b


if __name__ == "__main__":
    vocab_size = 16          # module sets sentence_length = vocab_size
    batch = 2

    key = jax.random.PRNGKey(0)
    pkey, xkey = jax.random.split(key)
    params = init_params(pkey, vocab_size)

    # x: (sentence_length, batch) integer token ids, as in the torch docstring
    x = jax.random.randint(xkey, (vocab_size, batch), 0, vocab_size, dtype=jnp.int32)

    logits = cnn_forward(x, params)
    logits = jax.block_until_ready(logits)

    ref = reference_forward(x, params)
    assert logits.shape == (batch, NUM_CLASSES), logits.shape
    assert jnp.allclose(logits, ref, atol=5e-3, rtol=5e-3), (logits, ref)

    print("KERNEL_OK")
</pallas_src>

<mosaic_0001>
module attributes {stable_mosaic.version = 11 : i64} {
  func.func @cnn_kernel(%arg0: i32, %arg1: memref<128x3xi32, #tpu.memory_space<vmem>>, %arg2: memref<48x128xbf16, #tpu.memory_space<vmem>>, %arg3: memref<1x128xf32, #tpu.memory_space<vmem>>, %arg4: memref<128x128xbf16, #tpu.memory_space<vmem>>, %arg5: memref<1x128xf32, #tpu.memory_space<vmem>>, %arg6: memref<8x128xf32, #tpu.memory_space<vmem>>) attributes {dimension_semantics = [#tpu.dimension_semantics<parallel>], iteration_bounds = array<i64: 1>, scalar_prefetch = 0 : i64, scratch_operands = 0 : i64, tpu.core_type = #tpu.core_type<tc>, window_params = [{transform_indices = @transform_0, window_bounds = array<i64: 128, 3>}, {pipeline_mode = #tpu.pipeline_mode<synchronous>, transform_indices = @transform_1, window_bounds = array<i64: 48, 128>}, {pipeline_mode = #tpu.pipeline_mode<synchronous>, transform_indices = @transform_2, window_bounds = array<i64: 1, 128>}, {pipeline_mode = #tpu.pipeline_mode<synchronous>, transform_indices = @transform_3, window_bounds = array<i64: 128, 128>}, {pipeline_mode = #tpu.pipeline_mode<synchronous>, transform_indices = @transform_4, window_bounds = array<i64: 1, 128>}, {transform_indices = @transform_5, window_bounds = array<i64: 8, 128>}]} {
    %0 = tpu.iota {dimensions = array<i32: 1>} : vector<128x48xi32>
    %c0 = arith.constant 0 : index
    %c0_0 = arith.constant 0 : index
    %1 = vector.load %arg1[%c0, %c0_0] : memref<128x3xi32, #tpu.memory_space<vmem>>, vector<128x1xi32>
    %2 = vector.broadcast %1 : vector<128x1xi32> to vector<128x48xi32>
    %3 = arith.cmpi eq, %0, %2 : vector<128x48xi32>
    %c0_1 = arith.constant 0 : index
    %c1 = arith.constant 1 : index
    %4 = vector.load %arg1[%c0_1, %c1] : memref<128x3xi32, #tpu.memory_space<vmem>>, vector<128x1xi32>
    %5 = vector.broadcast %4 : vector<128x1xi32> to vector<128x48xi32>
    %6 = arith.cmpi eq, %0, %5 : vector<128x48xi32>
    %7 = arith.ori %3, %6 : vector<128x48xi1>
    %c0_2 = arith.constant 0 : index
    %c2 = arith.constant 2 : index
    %8 = vector.load %arg1[%c0_2, %c2] : memref<128x3xi32, #tpu.memory_space<vmem>>, vector<128x1xi32>
    %9 = vector.broadcast %8 : vector<128x1xi32> to vector<128x48xi32>
    %10 = arith.cmpi eq, %0, %9 : vector<128x48xi32>
    %11 = arith.ori %7, %10 : vector<128x48xi1>
    %cst = arith.constant 1.000000e+00 : f32
    %cst_3 = arith.constant 0.000000e+00 : f32
    %12 = vector.broadcast %cst : f32 to vector<128x48xf32>
    %13 = vector.broadcast %cst_3 : f32 to vector<128x48xf32>
    %14 = arith.select %11, %12, %13 : vector<128x48xi1>, vector<128x48xf32>
    %15 = arith.truncf %14 : vector<128x48xf32> to vector<128x48xbf16>
    %c0_4 = arith.constant 0 : index
    %c0_5 = arith.constant 0 : index
    %16 = vector.load %arg2[%c0_4, %c0_5] : memref<48x128xbf16, #tpu.memory_space<vmem>>, vector<48x128xbf16>
    %cst_6 = arith.constant dense<0.000000e+00> : vector<128x128xf32>
    %17 = tpu.matmul %15, %16, %cst_6 {dimension_numbers = #tpu.dot_dimension_numbers<[1], [0], [0], [1], [0, 0, 1, 1], [], []>} : vector<128x48xbf16>, vector<48x128xbf16>, vector<128x128xf32> -> vector<128x128xf32>
    %c0_7 = arith.constant 0 : index
    %c0_8 = arith.constant 0 : index
    %18 = vector.load %arg3[%c0_7, %c0_8] : memref<1x128xf32, #tpu.memory_space<vmem>>, vector<1x128xf32>
    %19 = vector.broadcast %18 : vector<1x128xf32> to vector<128x128xf32>
    %20 = arith.addf %17, %19 : vector<128x128xf32>
    %cst_9 = arith.constant 0.000000e+00 : f32
    %21 = vector.broadcast %cst_9 : f32 to vector<128x128xf32>
    %22 = arith.maximumf %20, %21 : vector<128x128xf32>
    %23 = vector.shape_cast %22 : vector<128x128xf32> to vector<8x16x128xf32>
    %cst_10 = arith.constant dense<0xFF800000> : vector<8x128xf32>
    %24 = vector.multi_reduction <maximumf>, %23, %cst_10 [1] : vector<8x16x128xf32> to vector<8x128xf32>
    %25 = arith.truncf %24 : vector<8x128xf32> to vector<8x128xbf16>
    %c0_11 = arith.constant 0 : index
    %c0_12 = arith.constant 0 : index
    %26 = vector.load %arg4[%c0_11, %c0_12] : memref<128x128xbf16, #tpu.memory_space<vmem>>, vector<128x128xbf16>
    %cst_13 = arith.constant dense<0.000000e+00> : vector<8x128xf32>
    %27 = tpu.matmul %25, %26, %cst_13 {dimension_numbers = #tpu.dot_dimension_numbers<[1], [0], [0], [1], [0, 0, 1, 1], [], []>} : vector<8x128xbf16>, vector<128x128xbf16>, vector<8x128xf32> -> vector<8x128xf32>
    %c0_14 = arith.constant 0 : index
    %c0_15 = arith.constant 0 : index
    %28 = vector.load %arg5[%c0_14, %c0_15] : memref<1x128xf32, #tpu.memory_space<vmem>>, vector<1x128xf32>
    %29 = vector.broadcast %28 : vector<1x128xf32> to vector<8x128xf32>
    %30 = arith.addf %27, %29 : vector<8x128xf32>
    %c0_16 = arith.constant 0 : index
    %c0_17 = arith.constant 0 : index
    %31 = vector.load %arg6[%c0_16, %c0_17] : memref<8x128xf32, #tpu.memory_space<vmem>>, vector<8x128xf32>
    tpu.vector_store %arg6[%c0_16, %c0_17], %30 {strides = array<i32>} : memref<8x128xf32, #tpu.memory_space<vmem>>, vector<8x128xf32>,
    return
  }
  func.func @transform_0(%arg0: i32) -> (i32, i32) {
    %c0_i32 = arith.constant 0 : i32
    %c0_i32_0 = arith.constant 0 : i32
    return %arg0, %c0_i32 : i32, i32
  }
  func.func @transform_1(%arg0: i32) -> (i32, i32) {
    %c0_i32 = arith.constant 0 : i32
    %c0_i32_0 = arith.constant 0 : i32
    %c0_i32_1 = arith.constant 0 : i32
    return %c0_i32, %c0_i32_0 : i32, i32
  }
  func.func @transform_2(%arg0: i32) -> (i32, i32) {
    %c0_i32 = arith.constant 0 : i32
    %c0_i32_0 = arith.constant 0 : i32
    %c0_i32_1 = arith.constant 0 : i32
    return %c0_i32, %c0_i32_0 : i32, i32
  }
  func.func @transform_3(%arg0: i32) -> (i32, i32) {
    %c0_i32 = arith.constant 0 : i32
    %c0_i32_0 = arith.constant 0 : i32
    %c0_i32_1 = arith.constant 0 : i32
    return %c0_i32, %c0_i32_0 : i32, i32
  }
  func.func @transform_4(%arg0: i32) -> (i32, i32) {
    %c0_i32 = arith.constant 0 : i32
    %c0_i32_0 = arith.constant 0 : i32
    %c0_i32_1 = arith.constant 0 : i32
    return %c0_i32, %c0_i32_0 : i32, i32
  }
  func.func @transform_5(%arg0: i32) -> (i32, i32) {
    %c0_i32 = arith.constant 0 : i32
    %c0_i32_0 = arith.constant 0 : i32
    return %arg0, %c0_i32 : i32, i32
  }
}

</mosaic_0001>

<bundles_post_ra>
// kernel: tpu_custom_call.1
= control target key start
LH: loop header
LB: loop body
LE: loop exit
PB: predicated region body
PF: predicated region fallthrough
CT: control target
= control target key end

     0   :  { %v824_v2 = vmov 2   ;;  %v825_v3 = vmov 1   ;;  %v826_v8 = vmov 0   ;;  %s1091_s0 = inlined_call_operand.vmem [shape: s32[128,3], index: 0, kind: input, shape index: {}]   ;;  %s1092_s1 = inlined_call_operand.vmem [shape: bf16[48,128], index: 1, kind: input, shape index: {}]   ;;  %s1093_s2 = inlined_call_operand.vmem [shape: f32[1,128], index: 2, kind: input, shape index: {}]   ;;  %s1094_s3 = inlined_call_operand.vmem [shape: bf16[128,128], index: 3, kind: input, shape index: {}]   ;;  %s1095_s4 = inlined_call_operand.vmem [shape: f32[1,128], index: 4, kind: input, shape index: {}]   ;;  %s1096_s5 = inlined_call_operand.hbm [shape: f32[8,128], index: 5, kind: output, shape index: {}]  }
   0x1   :  { %v25_v0 = vld [vmem:[%s1091_s0 + $0x8] sm:$0xff]  ;;  %v24_v1 = vld [vmem:[%s1091_s0] sm:$0xff]  ;;  %772 = vset.pattern.permute.xlu0 %v824_v2  ;;  %768 = vset.pattern.permute.xlu1 %v825_v3  ;;  %v31_v5 = vld [vmem:[%s1091_s0 + $0x38] sm:$0xff] }
   0x2   :  { %188 = vperm.xlu0 %772, %v25_v0   ;;  %105 = vperm.xlu1 %768, %v24_v1   ;;  %v28_v4 = vld [vmem:[%s1091_s0 + $0x20] sm:$0xff]  ;;  %v27_v6 = vld [vmem:[%s1091_s0 + $0x18] sm:$0xff]  ;;  %v880_v7 = vld [vmem:[%s1091_s0 + $0x48] sm:$0xff] }
   0x6   :  { %197 = vperm.xlu0 %772, %v28_v4   ;;  %108 = vperm.xlu1 %768, %v25_v0  }
   0xa   :  { %206 = vperm.xlu0 %772, %v31_v5   ;;  %769 = vset.pattern.permute.xlu1 %v826_v8 }
   0xb   :  { %50 = vperm.xlu1 %769, %v27_v6  }
   0xc   :  { %10 = vsyncpa [#allocation3], 0  ;;  %v827_v9 = vmov 0.0   ;;  %v26_v10 = vld [vmem:[%s1091_s0 + $0x10] sm:$0xff]  ;;  %v29_v11 = vld [vmem:[%s1091_s0 + $0x28] sm:$0xff]  ;;  %v22_v29 = vlaneseq  ;;  %vm319_vm10 = vcmask 392192  }
   0xd   :  { %742 = vmatprep.subr.bf16.mxu1 %v827_v9  ;;  %v34_v12 = vld [vmem:[%s1091_s0 + $0x50] sm:$0xff]  ;;  %v36_v14 = vld [vmem:[%s1091_s0 + $0x60] sm:$0xff]  ;;  %v792_v15 = vld [vmem:[%s1092_s1 + $0x8] sm:$0xff]   ;;  %s829_s22 = smov [#allocation2]  }
   0xe   :  { %212 = vperm.xlu0 %772, %v880_v7   ;;  %v791_v13 = vld [vmem:[%s1092_s1 + $0x10] sm:$0xff]   ;;  %v793_v17 = vld [vmem:[%s1092_s1] sm:$0xff]   ;;  %v37_v18 = vld [vmem:[%s1091_s0 + $0x68] sm:$0xff]  ;;  %v950_v31 = vand.u32 127, %v22_v29  ;;  %s671_s1 = sshll.u32 %s829_s22, 4  ;;  %s672_s1 = int_to_ptr.vmem [resolvable:$true] %s671_s1 }
   0xf   :  { %770 = vset.pattern.permute.xlu1 %v825_v3  ;;  %720 = vmatprep.subr.bf16.mxu0 %v791_v13  ;;  %v30_v16 = vld [vmem:[%s1091_s0 + $0x30] sm:$0xff]  ;;  %v32_v19 = vld [vmem:[%s1091_s0 + $0x40] sm:$0xff]  ;;  %v39_v21 = vld [vmem:[%s1091_s0 + $0x78] sm:$0xff]  ;;  %s802_s23 = scalar_lea.vmem %s672_s1, 128  ;;  %p807_p1 = scmp.lt.s32.totalorder %s672_s1, %s672_s1 }
  0x10   :  { %114 = vperm.xlu1 %770, %v27_v6   ;;  %721 = vmatpush3.bf16.msra.mxu0 %v791_v13  ;;  %v38_v20 = vld [vmem:[%s1091_s0 + $0x70] sm:$0xff]  ;;  %v35_v22 = vld [vmem:[%s1091_s0 + $0x58] sm:$0xff]  ;;  %p803_p0 = scmp.ne.s32.totalorder %s672_s1, %s802_s23  ;;  %p808_p2 = scmp.lt.s32.totalorder %s802_s23, %s802_s23 }
  0x11   :  { %722 = vmatprep.subr.bf16.mxu0 %v792_v15 }
  0x12   :  { %783 = vset.pattern.permute.xlu0 %v826_v8  ;;  %p809_p3 = por %p808_p2, %p807_p1 }
  0x13   :  { %41 = vperm.xlu0 %783, %v24_v1  }
  0x14   :  { %771 = vset.pattern.permute.xlu1 %v824_v2  ;;  %723 = vmatpush3.bf16.msra.mxu0 %v792_v15  ;;  %p810_p4 = pnand %p809_p3, %p803_p0 }
  0x15   :  { %185 = vperm.xlu1 %771, %v24_v1   ;;  %724 = vmatprep.subr.bf16.mxu0 %v793_v17 }
  0x17   :  { %44 = vperm.xlu0 %783, %v25_v0  }
  0x18   :  { %725 = vmatpush3.bf16.msra.mxu0 %v793_v17 }
  0x19   :  { %191 = vperm.xlu1 %771, %v26_v10  }
  0x1b   :  { %47 = vperm.xlu0 %783, %v26_v10  }
  0x1d   :  { %194 = vperm.xlu1 %771, %v27_v6  }
  0x1f   :  { %53 = vperm.xlu0 %783, %v28_v4  }
  0x21   :  { %773 = vset.pattern.permute.xlu1 %v826_v8 }
  0x22   :  { %56 = vperm.xlu1 %773, %v29_v11  }
  0x23   :  { %68 = vperm.xlu0 %783, %v880_v7  }
  0x26   :  { %774 = vset.pattern.permute.xlu1 %v825_v3 }
  0x27   :  { %71 = vperm.xlu0 %783, %v34_v12   ;;  %117 = vperm.xlu1 %774, %v28_v4  }
  0x2b   :  { %77 = vperm.xlu0 %783, %v36_v14   ;;  %775 = vset.pattern.permute.xlu1 %v826_v8 }
  0x2c   :  { %59 = vperm.xlu1 %775, %v30_v16  }
  0x2f   :  { %784 = vset.pattern.permute.xlu0 %v825_v3 }
  0x30   :  { %111 = vperm.xlu0 %784, %v26_v10   ;;  %62 = vperm.xlu1 %775, %v31_v5  }
  0x34   :  { %120 = vperm.xlu0 %784, %v29_v11   ;;  %776 = vset.pattern.permute.xlu1 %v825_v3 }
  0x35   :  { %126 = vperm.xlu1 %776, %v31_v5  }
  0x38   :  { %123 = vperm.xlu0 %784, %v30_v16  }
  0x39   :  { %777 = vset.pattern.permute.xlu1 %v824_v2 }
  0x3a   :  { %200 = vperm.xlu1 %777, %v29_v11  }
  0x3c   :  { %135 = vperm.xlu0 %784, %v34_v12  }
  0x3e   :  { %203 = vperm.xlu1 %777, %v30_v16  }
  0x40   :  { %144 = vperm.xlu0 %784, %v37_v18  }
  0x42   :  { %778 = vset.pattern.permute.xlu1 %v826_v8 }
  0x43   :  { %65 = vperm.xlu1 %778, %v32_v19  }
  0x44   :  { %147 = vperm.xlu0 %784, %v38_v20  }
  0x47   :  { %779 = vset.pattern.permute.xlu1 %v825_v3 }
  0x48   :  { %129 = vperm.xlu1 %779, %v32_v19   ;;  %789 = vset.pattern.permute.xlu0 %v824_v2 }
  0x49   :  { %221 = vperm.xlu0 %789, %v36_v14  }
  0x4c   :  { %132 = vperm.xlu1 %779, %v880_v7  }
  0x4d   :  { %230 = vperm.xlu0 %789, %v39_v21  }
  0x50   :  { %780 = vset.pattern.permute.xlu1 %v826_v8 }
  0x51   :  { %74 = vperm.xlu1 %780, %v35_v22  }
  0x55   :  { %781 = vset.pattern.permute.xlu1 %v825_v3 }
  0x56   :  { %138 = vperm.xlu1 %781, %v35_v22  }
  0x5a   :  { %782 = vset.pattern.permute.xlu1 %v824_v2 }
  0x5b   :  { %209 = vperm.xlu1 %782, %v32_v19  }
  0x5f   :  { %215 = vperm.xlu1 %782, %v34_v12  }
  0x63   :  { %218 = vperm.xlu1 %782, %v35_v22  }
  0x67   :  { %785 = vset.pattern.permute.xlu1 %v826_v8 }
  0x68   :  { %80 = vperm.xlu1 %785, %v37_v18  }
  0x6c   :  { %786 = vset.pattern.permute.xlu1 %v825_v3 }
  0x6d   :  { %141 = vperm.xlu1 %786, %v36_v14  }
  0x71   :  { %787 = vset.pattern.permute.xlu1 %v826_v8 }
  0x72   :  { %83 = vperm.xlu1 %787, %v38_v20  }
  0x76   :  { %86 = vperm.xlu1 %787, %v39_v21  }
  0x7a   :  { %788 = vset.pattern.permute.xlu1 %v825_v3 }
  0x7b   :  { %150 = vperm.xlu1 %788, %v39_v21  }
  0x7d   :  { %v106_v23 = vpop.permute.xlu1 %105  ;;  %v189_v24 = vpop.permute.xlu0 %188 }
  0x7e   :  { %vm152_vm0 = vcmp.eq.s32.totalorder %v950_v31, %v106_v23  ;;  %vm233_vm4 = vcmp.eq.s32.totalorder %v950_v31, %v189_v24 }
  0x7f   :  { %790 = vset.pattern.permute.xlu1 %v824_v2 }
  0x80   :  { %224 = vperm.xlu1 %790, %v37_v18  }
  0x81   :  { %v109_v25 = vpop.permute.xlu1 %108  ;;  %v198_v26 = vpop.permute.xlu0 %197 }
  0x82   :  { %vm153_vm5 = vcmp.eq.s32.totalorder %v950_v31, %v109_v25 }
  0x84   :  { %227 = vperm.xlu1 %790, %v38_v20  }
  0x85   :  { %v946_v27 = vpop.permute.xlu0 %206 }
  0x86   :  { %v51_v28 = vpop.permute.xlu1 %50 }
  0x87   :  { %vm91_vm13 = vcmp.eq.s32.totalorder %v950_v31, %v51_v28 }
  0x89   :  { %v948_v30 = vpop.permute.xlu0 %212 }
  0x8b   :  { %v115_v32 = vpop.permute.xlu1 %114 }
  0x8c   :  { %vm155_vm11 = vcmp.eq.s32.totalorder %v950_v31, %v115_v32 }
  0x8d   :  { %vm171_vm15 = vmor %vm91_vm13, %vm155_vm11 }
  0x8e   :  { %v42_v33 = vpop.permute.xlu0 %41 }
  0x8f   :  { %vm88_vm1 = vcmp.eq.s32.totalorder %v950_v31, %v42_v33 }
  0x90   :  { %vm168_vm2 = vmor %vm88_vm1, %vm152_vm0  ;;  %v186_v34 = vpop.permute.xlu1 %185 }
  0x91   :  { %vm232_vm3 = vcmp.eq.s32.totalorder %v950_v31, %v186_v34 }
  0x92   :  { %v45_v35 = vpop.permute.xlu0 %44  ;;  %vm248_vm6 = vmor %vm168_vm2, %vm232_vm3 }
  0x93   :  { %vm89_vm7 = vcmp.eq.s32.totalorder %v950_v31, %v45_v35  ;;  %v264_v38 = vsel %vm248_vm6, 1.0, %v827_v9  ;;  %v794_v35 = vld [vmem:[%s1094_s3 + $0x38] sm:$0xff]  }
  0x94   :  { %vm169_vm8 = vmor %vm89_vm7, %vm153_vm5  ;;  %v192_v36 = vpop.permute.xlu1 %191  ;;  %vm236_vm7 = vcmp.eq.s32.totalorder %v950_v31, %v198_v26  ;;  %743 = vmatpush3.bf16.msra.mxu1 %v794_v35 }
  0x95   :  { %vm249_vm9 = vmor %vm169_vm8, %vm233_vm4  ;;  %vm234_vm2 = vcmp.eq.s32.totalorder %v950_v31, %v192_v36  ;;  %744 = vmatprep.subr.bf16.mxu1 %v827_v9  ;;  %v796_v36 = vld [vmem:[%s1094_s3 + $0x28] sm:$0xff]  }
  0x96   :  { %v48_v37 = vpop.permute.xlu0 %47  ;;  %v265_v39 = vsel %vm249_vm9, 1.0, %v827_v9 }
  0x97   :  { %v280_v40 = vpack.c.bf16 %v265_v39, %v264_v38  ;;  %vm90_vm14 = vcmp.eq.s32.totalorder %v950_v31, %v48_v37  ;;  %v797_v37 = vld [vmem:[%s1094_s3 + $0x20] sm:$0xff]   ;;  %v798_v38 = vld [vmem:[%s1094_s3 + $0x18] sm:$0xff]   ;;  %v799_v39 = vld [vmem:[%s1094_s3 + $0x10] sm:$0xff]  }
  0x98   :  { %v195_v41 = vpop.permute.xlu1 %194 }
  0x99   :  { %726 = vmatprep.mubr.msk.bf16.mxu0 %vm319_vm10, %v280_v40  ;;  %vm235_vm12 = vcmp.eq.s32.totalorder %v950_v31, %v195_v41  ;;  %v800_v40 = vld [vmem:[%s1094_s3 + $0x8] sm:$0xff]   ;;  %v801_v41 = vld [vmem:[%s1094_s3] sm:$0xff]  }
  0x9a   :  { %v54_v42 = vpop.permute.xlu0 %53  ;;  %vm251_vm0 = vmor %vm171_vm15, %vm235_vm12 }
  0x9b   :  { %vm92_vm4 = vcmp.eq.s32.totalorder %v950_v31, %v54_v42  ;;  %v267_v51 = vsel %vm251_vm0, 1.0, %v827_v9  ;;  %vm239_vm0 = vcmp.eq.s32.totalorder %v950_v31, %v946_v27 }
  0x9d   :  { %v57_v43 = vpop.permute.xlu1 %56 }
  0x9e   :  { %v69_v44 = vpop.permute.xlu0 %68  ;;  %vm93_vm12 = vcmp.eq.s32.totalorder %v950_v31, %v57_v43 }
  0xa2   :  { %v118_v45 = vpop.permute.xlu1 %117  ;;  %v961_v46 = vpop.permute.xlu0 %71 }
  0xa3   :  { %vm156_vm5 = vcmp.eq.s32.totalorder %v950_v31, %v118_v45 }
  0xa4   :  { %vm172_vm8 = vmor %vm92_vm4, %vm156_vm5 }
  0xa5   :  { %vm252_vm13 = vmor %vm172_vm8, %vm236_vm7 }
  0xa6   :  { %v963_v47 = vpop.permute.xlu0 %77  ;;  %v268_v58 = vsel %vm252_vm13, 1.0, %v827_v9 }
  0xa7   :  { %v60_v48 = vpop.permute.xlu1 %59 }
  0xa8   :  { %vm94_vm5 = vcmp.eq.s32.totalorder %v950_v31, %v60_v48 }
  0xab   :  { %v112_v49 = vpop.permute.xlu0 %111  ;;  %v63_v50 = vpop.permute.xlu1 %62 }
  0xac   :  { %vm154_vm1 = vcmp.eq.s32.totalorder %v950_v31, %v112_v49 }
  0xad   :  { %vm170_vm3 = vmor %vm90_vm14, %vm154_vm1  ;;  %vm95_vm14 = vcmp.eq.s32.totalorder %v950_v31, %v63_v50 }
  0xae   :  { %vm250_vm6 = vmor %vm170_vm3, %vm234_vm2 }
  0xaf   :  { %v266_v52 = vsel %vm250_vm6, 1.0, %v827_v9  ;;  %v121_v53 = vpop.permute.xlu0 %120 }
  0xb0   :  { %v281_v54 = vpack.c.bf16 %v267_v51, %v266_v52  ;;  %v127_v55 = vpop.permute.xlu1 %126  ;;  %vm157_vm9 = vcmp.eq.s32.totalorder %v950_v31, %v121_v53  ;;  %v1067_v53 = vld [vmem:[%s1093_s2] ss:$0 sm:$0xff] }
  0xb1   :  { %vm159_vm11 = vcmp.eq.s32.totalorder %v950_v31, %v127_v55  ;;  %vm173_vm15 = vmor %vm93_vm12, %vm157_vm9  ;;  %vm97_vm12 = vcmp.eq.s32.totalorder %v950_v31, %v69_v44 }
  0xb2   :  { %727 = vmatmul.mubr.msk.bf16.vlgmr.msra.gmra.mxu0 %vm319_vm10, %v281_v54  ;;  %vm175_vm1 = vmor %vm95_vm14, %vm159_vm11 }
  0xb3   :  { %v124_v56 = vpop.permute.xlu0 %123  ;;  %vm255_vm6 = vmor %vm175_vm1, %vm239_vm0 }
  0xb4   :  { %vm158_vm3 = vcmp.eq.s32.totalorder %v950_v31, %v124_v56  ;;  %v271_v62 = vsel %vm255_vm6, 1.0, %v827_v9 }
  0xb5   :  { %v201_v57 = vpop.permute.xlu1 %200  ;;  %vm174_vm7 = vmor %vm94_vm5, %vm158_vm3  ;;  %vm98_vm5 = vcmp.eq.s32.totalorder %v950_v31, %v961_v46 }
  0xb6   :  { %vm237_vm2 = vcmp.eq.s32.totalorder %v950_v31, %v201_v57 }
  0xb7   :  { %vm253_vm4 = vmor %vm173_vm15, %vm237_vm2  ;;  %vm241_vm15 = vcmp.eq.s32.totalorder %v950_v31, %v948_v30  ;;  %v136_v7 = vpop.permute.xlu0 %135 }
  0xb8   :  { %v269_v59 = vsel %vm253_vm4, 1.0, %v827_v9  ;;  %vm162_vm6 = vcmp.eq.s32.totalorder %v950_v31, %v136_v7 }
  0xb9   :  { %v282_v60 = vpack.c.bf16 %v269_v59, %v268_v58  ;;  %v204_v61 = vpop.permute.xlu1 %203 }
  0xba   :  { %vm238_vm8 = vcmp.eq.s32.totalorder %v950_v31, %v204_v61 }
  0xbb   :  { %vm254_vm9 = vmor %vm174_vm7, %vm238_vm8  ;;  %730 = vmatprep.mubr.msk.bf16.mxu0 %vm319_vm10, %v282_v60  ;;  %v145_v19 = vpop.permute.xlu0 %144 }
  0xbc   :  { %v270_v63 = vsel %vm254_vm9, 1.0, %v827_v9  ;;  %vm178_vm9 = vmor %vm98_vm5, %vm162_vm6 }
  0xbd   :  { %v283_v0 = vpack.c.bf16 %v271_v62, %v270_v63 }
  0xbe   :  { %v66_v1 = vpop.permute.xlu1 %65 }
  0xbf   :  { %731 = vmatmul.mubr.msk.bf16.gmra.mxu0 %vm319_vm10, %v283_v0  ;;  %vm96_vm0 = vcmp.eq.s32.totalorder %v950_v31, %v66_v1  ;;  %v148_v21 = vpop.permute.xlu0 %147 }
  0xc3   :  { %v130_v2 = vpop.permute.xlu1 %129 }
  0xc4   :  { %vm160_vm14 = vcmp.eq.s32.totalorder %v950_v31, %v130_v2  ;;  %v222_v23 = vpop.permute.xlu0 %221 }
  0xc5   :  { %vm176_vm2 = vmor %vm96_vm0, %vm160_vm14  ;;  %vm244_vm5 = vcmp.eq.s32.totalorder %v950_v31, %v222_v23 }
  0xc7   :  { %v133_v3 = vpop.permute.xlu1 %132 }
  0xc8   :  { %vm161_vm11 = vcmp.eq.s32.totalorder %v950_v31, %v133_v3  ;;  %v231_v25 = vpop.permute.xlu0 %230 }
  0xc9   :  { %vm177_vm13 = vmor %vm97_vm12, %vm161_vm11 }
  0xca   :  { %vm257_vm1 = vmor %vm177_vm13, %vm241_vm15 }
  0xcb   :  { %v273_v8 = vsel %vm257_vm1, 1.0, %v827_v9  ;;  %vm100_vm1 = vcmp.eq.s32.totalorder %v950_v31, %v963_v47 }
  0xcc   :  { %v75_v4 = vpop.permute.xlu1 %74 }
  0xcd   :  { %vm99_vm11 = vcmp.eq.s32.totalorder %v950_v31, %v75_v4 }
  0xd1   :  { %v139_v5 = vpop.permute.xlu1 %138 }
  0xd2   :  { %vm163_vm8 = vcmp.eq.s32.totalorder %v950_v31, %v139_v5 }
  0xd3   :  { %vm179_vm13 = vmor %vm99_vm11, %vm163_vm8 }
  0xd6   :  { %v210_v6 = vpop.permute.xlu1 %209 }
  0xd7   :  { %vm240_vm3 = vcmp.eq.s32.totalorder %v950_v31, %v210_v6 }
  0xd8   :  { %vm256_vm4 = vmor %vm176_vm2, %vm240_vm3  ;;  %vm165_vm2 = vcmp.eq.s32.totalorder %v950_v31, %v145_v19 }
  0xd9   :  { %v272_v10 = vsel %vm256_vm4, 1.0, %v827_v9 }
  0xda   :  { %v284_v11 = vpack.c.bf16 %v273_v8, %v272_v10  ;;  %v216_v12 = vpop.permute.xlu1 %215 }
  0xdb   :  { %vm242_vm7 = vcmp.eq.s32.totalorder %v950_v31, %v216_v12 }
  0xdc   :  { %734 = vmatprep.mubr.msk.bf16.mxu0 %vm319_vm10, %v284_v11  ;;  %vm258_vm12 = vmor %vm178_vm9, %vm242_vm7 }
  0xdd   :  { %v274_v14 = vsel %vm258_vm12, 1.0, %v827_v9  ;;  %vm247_vm12 = vcmp.eq.s32.totalorder %v950_v31, %v231_v25 }
  0xde   :  { %v219_v13 = vpop.permute.xlu1 %218 }
  0xdf   :  { %vm243_vm14 = vcmp.eq.s32.totalorder %v950_v31, %v219_v13 }
  0xe0   :  { %vm259_vm15 = vmor %vm179_vm13, %vm243_vm14 }
  0xe1   :  { %v275_v15 = vsel %vm259_vm15, 1.0, %v827_v9 }
  0xe2   :  { %v285_v16 = vpack.c.bf16 %v275_v15, %v274_v14 }
  0xe3   :  { %v81_v17 = vpop.permute.xlu1 %80 }
  0xe4   :  { %735 = vmatmul.mubr.msk.bf16.gmra.mxu0 %vm319_vm10, %v285_v16  ;;  %vm101_vm3 = vcmp.eq.s32.totalorder %v950_v31, %v81_v17 }
  0xe5   :  { %vm181_vm7 = vmor %vm101_vm3, %vm165_vm2 }
  0xe8   :  { %v142_v18 = vpop.permute.xlu1 %141 }
  0xe9   :  { %vm164_vm0 = vcmp.eq.s32.totalorder %v950_v31, %v142_v18 }
  0xea   :  { %vm180_vm4 = vmor %vm100_vm1, %vm164_vm0  ;;  %vm166_vm0 = vcmp.eq.s32.totalorder %v950_v31, %v148_v21 }
  0xeb   :  { %vm260_vm8 = vmor %vm180_vm4, %vm244_vm5  ;;  %vm560_vm5 = vcmask 1041409  }
  0xec   :  { %v276_v27 = vsel %vm260_vm8, 1.0, %v827_v9  ;;  %vm566_vm8 = vcmask 1044484  }
  0xed   :  { %v84_v20 = vpop.permute.xlu1 %83 }
  0xee   :  { %vm102_vm14 = vcmp.eq.s32.totalorder %v950_v31, %v84_v20 }
  0xef   :  { %vm182_vm2 = vmor %vm102_vm14, %vm166_vm0 }
  0xf1   :  { %v87_v22 = vpop.permute.xlu1 %86 }
  0xf2   :  { %vm103_vm9 = vcmp.eq.s32.totalorder %v950_v31, %v87_v22 }
  0xf6   :  { %v151_v24 = vpop.permute.xlu1 %150 }
  0xf7   :  { %vm167_vm6 = vcmp.eq.s32.totalorder %v950_v31, %v151_v24 }
  0xf8   :  { %vm183_vm11 = vmor %vm103_vm9, %vm167_vm6  ;;  %vm562_vm6 = vcmask 1042434   ;;  %vm568_vm9 = vcmask 1045509  }
  0xf9   :  { %vm263_vm1 = vmor %vm183_vm11, %vm247_vm12  ;;  %vm570_vm11 = vcmask 1046534   ;;  %vm572_vm12 = vcmask 1047559  }
  0xfa   :  { %v279_v32 = vsel %vm263_vm1, 1.0, %v827_v9 }
  0xfb   :  { %v225_v26 = vpop.permute.xlu1 %224 }
  0xfc   :  { %vm245_vm13 = vcmp.eq.s32.totalorder %v950_v31, %v225_v26 }
  0xfd   :  { %vm261_vm15 = vmor %vm181_vm7, %vm245_vm13  ;;  %vm564_vm7 = vcmask 1043459  }
  0xfe   :  { %v277_v28 = vsel %vm261_vm15, 1.0, %v827_v9 }
  0xff   :  { %v286_v29 = vpack.c.bf16 %v277_v28, %v276_v27  ;;  %v228_v30 = vpop.permute.xlu1 %227 }
 0x100   :  { %vm246_vm3 = vcmp.eq.s32.totalorder %v950_v31, %v228_v30  ;;  %v795_v31 = vld [vmem:[%s1094_s3 + $0x30] sm:$0xff]  }
 0x101   :  { %vm262_vm4 = vmor %vm182_vm2, %vm246_vm3  ;;  %738 = vmatprep.mubr.msk.bf16.mxu0 %vm319_vm10, %v286_v29  ;;  %745 = vmatpush3.bf16.msra.mxu1 %v795_v31 }
 0x102   :  { %v278_v33 = vsel %vm262_vm4, 1.0, %v827_v9  ;;  %746 = vmatprep.subr.bf16.mxu1 %v827_v9 }
 0x103   :  { %v287_v34 = vpack.c.bf16 %v279_v32, %v278_v33 }
 0x105   :  { %739 = vmatmul.mubr.msk.bf16.gmra.mxu0 %vm319_vm10, %v287_v34  ;;  %747 = vmatpush3.bf16.msra.mxu1 %v796_v36  ;;  %vm828_vm10 = vmmov 0  }
 0x106   :  { %748 = vmatprep.subr.bf16.mxu1 %v827_v9  ;;  %758 = vmatprep.mubr.msk.bf16.mxu1 %vm828_vm10, %v827_v9 }
 0x109   :  { %749 = vmatpush3.bf16.msra.mxu1 %v797_v37 }
 0x10a   :  { %750 = vmatprep.subr.bf16.mxu1 %v827_v9 }
 0x10d   :  { %751 = vmatpush3.bf16.msra.mxu1 %v798_v38 }
 0x10e   :  { %752 = vmatprep.subr.bf16.mxu1 %v827_v9 }
 0x111   :  { %753 = vmatpush3.bf16.msra.mxu1 %v799_v39 }
 0x112   :  { %754 = vmatprep.subr.bf16.mxu1 %v827_v9 }
 0x115   :  { %755 = vmatpush3.bf16.msra.mxu1 %v800_v40 }
 0x116   :  { %756 = vmatprep.subr.bf16.mxu1 %v827_v9 }
 0x119   :  { %757 = vmatpush3.bf16.msra.mxu1 %v801_v41 }
 0x172   :  { %v728_v42 = vpop.f32.mrf.mxu0 }
 0x173   :  { %v387_v59 = vadd.f32 %v728_v42, %v1067_v53 }
 0x174   :  { %v378_v43 = vpop.f32.mrf.mxu0 }
 0x175   :  { %v379_v55 = vadd.f32 %v1067_v53, %v378_v43  ;;  %v443_v4 = vmax.f32 %v387_v59, 0.0 }
 0x176   :  { %v729_v44 = vpop.f32.mrf.mxu0 }
 0x177   :  { %v390_v56 = vadd.f32 %v729_v44, %v1067_v53  ;;  %v441_v63 = vmax.f32 %v379_v55, 0.0 }
 0x178   :  { %v381_v45 = vpop.f32.mrf.mxu0 }
 0x179   :  { %v382_v54 = vadd.f32 %v1067_v53, %v381_v45  ;;  %v444_v0 = vmax.f32 %v390_v56, 0.0 }
 0x17b   :  { %v442_v60 = vmax.f32 %v382_v54, 0.0  ;;  %v464_v10 = vmax.f32 %v443_v4, %v444_v0 }
 0x17d   :  { %v457_v5 = vmax.f32 %v441_v63, %v442_v60  ;;  %v465_v19 = vrot.slane %v464_v10, 4 }
 0x17f   :  { %v732_v46 = vpop.f32.mrf.mxu0  ;;  %v458_v14 = vrot.slane %v457_v5, 4  ;;  %v466_v26 = vmax.f32 %v464_v10, %v465_v19 }
 0x180   :  { %v403_v6 = vadd.f32 %v732_v46, %v1067_v53 }
 0x181   :  { %v394_v47 = vpop.f32.mrf.mxu0  ;;  %v459_v22 = vmax.f32 %v457_v5, %v458_v14  ;;  %v467_v33 = vrot.slane %v466_v26, 2 }
 0x182   :  { %v395_v57 = vadd.f32 %v1067_v53, %v394_v47  ;;  %v447_v15 = vmax.f32 %v403_v6, 0.0 }
 0x183   :  { %v733_v48 = vpop.f32.mrf.mxu0  ;;  %v460_v29 = vrot.slane %v459_v22, 2  ;;  %v468_v39 = vmax.f32 %v466_v26, %v467_v33 }
 0x184   :  { %v445_v1 = vmax.f32 %v395_v57, 0.0  ;;  %v406_v2 = vadd.f32 %v733_v48, %v1067_v53 }
 0x185   :  { %v397_v49 = vpop.f32.mrf.mxu0  ;;  %v461_v31 = vmax.f32 %v459_v22, %v460_v29 }
 0x186   :  { %v398_v9 = vadd.f32 %v1067_v53, %v397_v49  ;;  %v448_v11 = vmax.f32 %v406_v2, 0.0 }
 0x187   :  { %v462_v44 = vrot.slane %v461_v31, 1 }
 0x188   :  { %v446_v61 = vmax.f32 %v398_v9, 0.0  ;;  %v478_v20 = vmax.f32 %v447_v15, %v448_v11 }
 0x189   :  { %v463_v57 = vmax.f32 %v461_v31, %v462_v44 }
 0x18a   :  { %v471_v7 = vmax.f32 %v445_v1, %v446_v61  ;;  %v479_v27 = vrot.slane %v478_v20, 4 }
 0x18b   :  { %v513_v4 = vpack.c.bf16 %v463_v57, %v463_v57 }
 0x18c   :  { %v472_v16 = vrot.slane %v471_v7, 4  ;;  %v480_v34 = vmax.f32 %v478_v20, %v479_v27 }
 0x18d   :  { %v552_v14 = vunpack.c.l.b16 %v513_v4 }
 0x18e   :  { %v473_v23 = vmax.f32 %v471_v7, %v472_v16  ;;  %v481_v40 = vrot.slane %v480_v34, 2 }
 0x190   :  { %v474_v30 = vrot.slane %v473_v23, 2 }
 0x192   :  { %v475_v36 = vmax.f32 %v473_v23, %v474_v30 }
 0x194   :  { %v476_v45 = vrot.slane %v475_v36, 1 }
 0x1a4   :  { %v736_v50 = vpop.f32.mrf.mxu0 }
 0x1a5   :  { %v419_v17 = vadd.f32 %v736_v50, %v1067_v53  ;;  %v469_v50 = vrot.slane %v468_v39, 1 }
 0x1a6   :  { %v410_v51 = vpop.f32.mrf.mxu0 }
 0x1a7   :  { %v411_v3 = vadd.f32 %v1067_v53, %v410_v51  ;;  %v451_v24 = vmax.f32 %v419_v17, 0.0  ;;  %v482_v51 = vmax.f32 %v480_v34, %v481_v40  ;;  %v470_v63 = vmax.f32 %v468_v39, %v469_v50 }
 0x1a8   :  { %v737_v52 = vpop.f32.mrf.mxu0 }
 0x1a9   :  { %v422_v12 = vadd.f32 %v737_v52, %v1067_v53  ;;  %v449_v13 = vmax.f32 %v411_v3, 0.0  ;;  %v483_v0 = vrot.slane %v482_v51, 1  ;;  %v514_v10 = vpack.c.bf16 %v470_v63, %v470_v63 }
 0x1aa   :  { %v413_v58 = vpop.f32.mrf.mxu0 }
 0x1ab   :  { %v414_v62 = vadd.f32 %v1067_v53, %v413_v58  ;;  %v452_v21 = vmax.f32 %v422_v12, 0.0  ;;  %v477_v58 = vmax.f32 %v475_v36, %v476_v45  ;;  %v484_v11 = vmax.f32 %v482_v51, %v483_v0 }
 0x1ac   :  { %v553_v19 = vunpack.c.l.b16 %v514_v10 }
 0x1ad   :  { %v450_v8 = vmax.f32 %v414_v62, 0.0  ;;  %v492_v28 = vmax.f32 %v451_v24, %v452_v21  ;;  %v515_v5 = vpack.c.bf16 %v477_v58, %v477_v58  ;;  %v516_v20 = vpack.c.bf16 %v484_v11, %v484_v11 }
 0x1ae   :  { %v561_v24 = vsel %vm560_vm5, %v553_v19, %v552_v14 }
 0x1af   :  { %v485_v18 = vmax.f32 %v449_v13, %v450_v8  ;;  %v493_v35 = vrot.slane %v492_v28, 4  ;;  %v554_v15 = vunpack.c.l.b16 %v515_v5  ;;  %v555_v29 = vunpack.c.l.b16 %v516_v20 }
 0x1b1   :  { %v486_v25 = vrot.slane %v485_v18, 4  ;;  %v494_v41 = vmax.f32 %v492_v28, %v493_v35 }
 0x1b3   :  { %v487_v32 = vmax.f32 %v485_v18, %v486_v25  ;;  %v495_v52 = vrot.slane %v494_v41, 2  ;;  %v563_v25 = vsel %vm562_vm6, %v554_v15, %v561_v24 }
 0x1b4   :  { %v565_v34 = vsel %vm564_vm7, %v555_v29, %v563_v25 }
 0x1b5   :  { %v488_v38 = vrot.slane %v487_v32, 2  ;;  %v496_v1 = vmax.f32 %v494_v41, %v495_v52 }
 0x1b7   :  { %v489_v47 = vmax.f32 %v487_v32, %v488_v38  ;;  %v497_v12 = vrot.slane %v496_v1, 1 }
 0x1b9   :  { %v490_v59 = vrot.slane %v489_v47, 1  ;;  %v498_v21 = vmax.f32 %v496_v1, %v497_v12 }
 0x1bb   :  { %v491_v6 = vmax.f32 %v489_v47, %v490_v59  ;;  %v518_v30 = vpack.c.bf16 %v498_v21, %v498_v21 }
 0x1bd   :  { %v517_v16 = vpack.c.bf16 %v491_v6, %v491_v6  ;;  %v557_v36 = vunpack.c.l.b16 %v518_v30 }
 0x1bf   :  { %v556_v26 = vunpack.c.l.b16 %v517_v16 }
 0x1c1   :  { %v567_v31 = vsel %vm566_vm8, %v556_v26, %v565_v34 }
 0x1c2   :  { %v569_v39 = vsel %vm568_vm9, %v557_v36, %v567_v31 }
 0x1c5   :  { %v740_v37 = vpop.f32.mrf.mxu0 }
 0x1c6   :  { %v435_v43 = vadd.f32 %v740_v37, %v1067_v53 }
 0x1c7   :  { %v426_v42 = vpop.f32.mrf.mxu0 }
 0x1c8   :  { %v427_v48 = vadd.f32 %v1067_v53, %v426_v42  ;;  %v455_v9 = vmax.f32 %v435_v43, 0.0  ;;  %v691_v43 = vld [vmem:[%s1095_s4] ss:$0 sm:$0xff] }
 0x1c9   :  { %v741_v46 = vpop.f32.mrf.mxu0 }
 0x1ca   :  { %v438_v49 = vadd.f32 %v741_v46, %v1067_v53  ;;  %v453_v60 = vmax.f32 %v427_v48, 0.0 }
 0x1cb   :  { %v429_v54 = vpop.f32.mrf.mxu0 }
 0x1cc   :  { %v456_v55 = vmax.f32 %v438_v49, 0.0  ;;  %v430_v56 = vadd.f32 %v1067_v53, %v429_v54 }
 0x1ce   :  { %v506_v61 = vmax.f32 %v455_v9, %v456_v55  ;;  %v454_v62 = vmax.f32 %v430_v56, 0.0 }
 0x1d0   :  { %v507_v2 = vrot.slane %v506_v61, 4  ;;  %v499_v3 = vmax.f32 %v453_v60, %v454_v62 }
 0x1d2   :  { %v508_v7 = vmax.f32 %v506_v61, %v507_v2  ;;  %v500_v8 = vrot.slane %v499_v3, 4 }
 0x1d4   :  { %v509_v53 = vrot.slane %v508_v7, 2  ;;  %v501_v13 = vmax.f32 %v499_v3, %v500_v8 }
 0x1d6   :  { %v510_v17 = vmax.f32 %v508_v7, %v509_v53  ;;  %v502_v18 = vrot.slane %v501_v13, 2 }
 0x1d8   :  { %v511_v22 = vrot.slane %v510_v17, 1  ;;  %v503_v23 = vmax.f32 %v501_v13, %v502_v18 }
 0x1da   :  { %v512_v27 = vmax.f32 %v510_v17, %v511_v22  ;;  %v504_v28 = vrot.slane %v503_v23, 1 }
 0x1dc   :  { %v505_v32 = vmax.f32 %v503_v23, %v504_v28  ;;  %v520_v33 = vpack.c.bf16 %v512_v27, %v512_v27 }
 0x1de   :  { %v519_v35 = vpack.c.bf16 %v505_v32, %v505_v32  ;;  %v559_v38 = vunpack.c.l.b16 %v520_v33 }
 0x1e0   :  { %v558_v37 = vunpack.c.l.b16 %v519_v35 }
 0x1e2   :  { %v571_v40 = vsel %vm570_vm11, %v558_v37, %v569_v39 }
 0x1e3   :  { %v573_v41 = vsel %vm572_vm12, %v559_v38, %v571_v40 }
 0x1e4   :  { %v574_v42 = vpack.c.b16 %v573_v41, %v573_v41 }
 0x1e6   :  { %759 = vmatmul.mubr.bf16.vlgmr.msra.gmra.mxu1 %v574_v42 }
 0x2a6   :  { %v658_v44 = vpop.f32.mrf.mxu1 }
 0x2a7   :  { %v659_v45 = vadd.f32 %v691_v43, %v658_v44 }
 0x2a8   :  { %v760_v46 = vpop.f32.mrf.mxu1 }
 0x2a9   :  { %664 = vst [vmem:[#allocation2] sm:$0xff] %v659_v45 }
 0x2aa   :  { %v661_v47 = vpop.f32.mrf.mxu1 }
 0x2ab   :  { %813 = shalt.err (!%p810_p4)
}
 0x2ac   :  { %674 = dma.vmem_to_hbm [thread:$0]  %s672_s1, 128, %s1096_s5, [#allocation3]   ;;  %v761_v48 = vpop.f32.mrf.mxu1 }
 0x2ad   :  { %822 = dma.done.wait [#allocation3], 128  }
 0x2ae   :  { %823 = vsyncadd [#allocation3], 4294967168 }
 0x2af   :  { %678 = vsyncpa [#allocation3], 1 }

</bundles_post_ra>
